<compile_context>
chip_gen: v5e
topology: v5e:2x2
jax: 0.10.0
libtpu: 0.0.40
codegen_flags: <defaults>
</compile_context>

<pallas_src>
import jax
import jax.numpy as jnp
from jax.experimental import pallas as pl
from jax.experimental.pallas import tpu as pltpu

# ------------------------- static configuration -------------------------
N = 16       # number of nodes
F_IN = 32    # dataset.num_features
HID = 32     # args.hidden
C = 8        # dataset.num_classes
K = 3        # args.K  (niter of the power iteration)
ALPHA = 0.1  # args.alpha
BETA = 0.9   # fixed in GNNsHF.__init__


def _align8(r):
    return (r + 7) & ~7


# Packed-constant slab layout (row offsets are 8-aligned so the in-kernel
# static slices start on sublane boundaries).  P is appended after the MLP
# parameters so a single DMA carries every per-graph constant.
R_W1 = 0
R_B1 = _align8(R_W1 + F_IN)
R_W2 = _align8(R_B1 + 1)
R_B2 = _align8(R_W2 + HID)
R_P = _align8(R_B2 + 1)
SLAB_ROWS = _align8(R_P + N)
SLAB_COLS = max(HID, C, N)


# ------------------------------ kernel ----------------------------------
def gnn_hf_kernel(x_ref, w_ref, out_ref):
    # ----- MLP: lin1 -> relu -> lin2 (dropout = identity at eval) -----
    x = x_ref[...]
    w1 = w_ref[R_W1:R_W1 + F_IN, :HID]
    b1 = w_ref[R_B1:R_B1 + 1, :HID]
    w2 = w_ref[R_W2:R_W2 + HID, :C]
    b2 = w_ref[R_B2:R_B2 + 1, :C]
    p = w_ref[R_P:R_P + N, :N]

    h = jnp.dot(x, w1, preferred_element_type=jnp.float32) + b1
    h = jnp.maximum(h, 0.0)
    local = jnp.dot(h, w2, preferred_element_type=jnp.float32) + b2

    # ----- HFPowerIteration, collapsed to one matmul with the precomputed
    # propagation operator P (constants and the K-step chain folded in). -----
    preds = jnp.dot(p, local, preferred_element_type=jnp.float32)

    # ----- log_softmax over classes (dim=1) -----
    m = jnp.max(preds, axis=1, keepdims=True)
    z = preds - m
    lse = jnp.log(jnp.sum(jnp.exp(z), axis=1, keepdims=True))
    out_ref[...] = z - lse


# --------------------------- wrapper / glue -------------------------------
def calc_M(adj):
    """M = D^{-1/2} (A + I) D^{-1/2}  (HFPowerIteration._calc_A_hat)."""
    n = adj.shape[0]
    A = adj + jnp.eye(n, dtype=jnp.float32)
    d = jnp.sum(A, axis=1)
    d_inv_sqrt = 1.0 / jnp.sqrt(d)
    return d_inv_sqrt[:, None] * A * d_inv_sqrt[None, :]


def build_propagation_operator(M, alpha=ALPHA, beta=BETA, niter=K):
    """Fold HFPowerIteration (L_hat, A_hat, all scalar constants and the K
    serially dependent iterations) into a single dense [N,N] operator P such
    that preds = P @ local_preds.  One-time per-graph cost outside the kernel
    (inference-only: train-time dropout on A_hat would invalidate the fold)."""
    n = M.shape[0]
    eye = jnp.eye(n, dtype=jnp.float32)
    c1 = 1.0 / (alpha * beta + 1.0)
    cA = (alpha * beta + 1.0 - alpha) / (alpha * beta + 1.0)
    L_hat = eye - M
    A_hat = cA * M
    P = c1 * eye + (beta * c1) * L_hat      # preds_0 = P0 @ local
    Lp = alpha * P                          # local_preds = alpha * preds_0
    for _ in range(niter):                  # preds_{k+1} = A_hat @ preds_k + Lp@local
        P = A_hat @ P + Lp
    return P


def pack_constants(w1, b1, w2, b2, P):
    """Coalesce the MLP parameters AND the folded propagation operator into
    one 8-row-aligned f32 slab (one DMA instead of five)."""
    slab = jnp.zeros((SLAB_ROWS, SLAB_COLS), dtype=jnp.float32)
    slab = slab.at[R_W1:R_W1 + F_IN, :HID].set(w1)
    slab = slab.at[R_B1, :HID].set(b1.reshape(-1))
    slab = slab.at[R_W2:R_W2 + HID, :C].set(w2)
    slab = slab.at[R_B2, :C].set(b2.reshape(-1))
    slab = slab.at[R_P:R_P + N, :N].set(P)
    return slab


def _cost_estimate(batch=1):
    # Advisory hint so XLA doesn't treat the opaque custom call as heavyweight.
    flops = 2 * batch * (N * F_IN * HID + N * HID * C + N * N * C)
    transcendentals = batch * (N * C + N)          # exp per element + log per row
    bytes_accessed = (batch * N * F_IN * 4
                      + SLAB_ROWS * SLAB_COLS * 4
                      + batch * N * C * 4)
    return pl.CostEstimate(flops=flops,
                           transcendentals=transcendentals,
                           bytes_accessed=bytes_accessed)


def gnn_hf_forward(x, slab):
    """Single feature matrix: gridless single-shot call (2 input DMAs)."""
    vmem = pl.BlockSpec(memory_space=pltpu.MemorySpace.VMEM)
    return pl.pallas_call(
        gnn_hf_kernel,
        out_shape=jax.ShapeDtypeStruct((N, C), jnp.float32),
        in_specs=[vmem, vmem],
        out_specs=vmem,
        cost_estimate=_cost_estimate(1),
    )(x, slab)


def gnn_hf_forward_batched(xb, slab):
    """Multiple feature matrices: grid=(B,) parallel axis amortizes launch
    overhead, double-buffers x, and shards across v7x's 2 TensorCores."""
    B = xb.shape[0]
    return pl.pallas_call(
        gnn_hf_kernel,
        out_shape=jax.ShapeDtypeStruct((B, N, C), jnp.float32),
        grid=(B,),
        in_specs=[
            pl.BlockSpec((None, N, F_IN), lambda b: (b, 0, 0)),
            # constant slab: same block every step -> stays resident in VMEM
            pl.BlockSpec((SLAB_ROWS, SLAB_COLS), lambda b: (0, 0)),
        ],
        out_specs=pl.BlockSpec((None, N, C), lambda b: (b, 0, 0)),
        compiler_params=pltpu.CompilerParams(
            dimension_semantics=("parallel",)),
        cost_estimate=_cost_estimate(B),
    )(xb, slab)


# Plain-JAX reference that follows the original step-by-step module math
# (used to validate the operator folding).
def reference_forward(x, w1, b1, w2, b2, M):
    h = jnp.maximum(x @ w1 + b1, 0.0)
    local = h @ w2 + b2
    n = M.shape[0]
    L_hat = jnp.eye(n, dtype=jnp.float32) - M
    A_hat = (ALPHA * BETA + 1.0 - ALPHA) / (ALPHA * BETA + 1.0) * M
    c1 = 1.0 / (ALPHA * BETA + 1.0)
    preds = c1 * local + (BETA * c1) * (L_hat @ local)
    local_preds = ALPHA * preds
    for _ in range(K):
        preds = A_hat @ preds + local_preds
    return jax.nn.log_softmax(preds, axis=1)


# ------------------------------- main ------------------------------------
if __name__ == "__main__":
    key = jax.random.PRNGKey(0)
    kx, kx2, kadj, kw1, kb1, kw2, kb2 = jax.random.split(key, 7)

    # Node features (two matrices so the batched path is exercised too).
    x = jax.random.normal(kx, (N, F_IN), dtype=jnp.float32)
    x2 = jax.random.normal(kx2, (N, F_IN), dtype=jnp.float32)

    # Deterministic random undirected 0/1 adjacency (no self loops).
    upper = (jax.random.uniform(kadj, (N, N)) < 0.25).astype(jnp.float32)
    adj = jnp.triu(upper, 1)
    adj = adj + adj.T

    # Graph operator (one-time per graph): M, then the folded propagation P.
    M = calc_M(adj)
    P = build_propagation_operator(M)

    # Deterministic synthetic Linear parameters (stored as [in, out]).
    w1 = jax.random.normal(kw1, (F_IN, HID), dtype=jnp.float32) * 0.1
    b1 = jax.random.normal(kb1, (1, HID), dtype=jnp.float32) * 0.01
    w2 = jax.random.normal(kw2, (HID, C), dtype=jnp.float32) * 0.1
    b2 = jax.random.normal(kb2, (1, C), dtype=jnp.float32) * 0.01

    slab = pack_constants(w1, b1, w2, b2, P)

    # ---- single-shot path ----
    out = gnn_hf_forward(x, slab)
    out = jax.block_until_ready(out)
    assert out.shape == (N, C)
    # log_softmax rows must sum (in prob space) to ~1
    assert bool(jnp.allclose(jnp.sum(jnp.exp(out), axis=1), 1.0, atol=1e-4))
    # cross-check the folded operator against the step-by-step reference
    ref = reference_forward(x, w1, b1, w2, b2, M)
    assert bool(jnp.allclose(out, ref, atol=1e-4))

    # ---- batched path (B feature matrices, one launch) ----
    xb = jnp.stack([x, x2], axis=0)
    outb = gnn_hf_forward_batched(xb, slab)
    outb = jax.block_until_ready(outb)
    assert outb.shape == (2, N, C)
    assert bool(jnp.allclose(outb[0], out, atol=1e-5))
    ref2 = reference_forward(x2, w1, b1, w2, b2, M)
    assert bool(jnp.allclose(outb[1], ref2, atol=1e-4))

    print("KERNEL_OK")
</pallas_src>

<mosaic_0001>
module attributes {stable_mosaic.version = 11 : i64} {
  func.func @gnn_hf_kernel(%arg0: memref<16x32xf32, #tpu.memory_space<vmem>>, %arg1: memref<96x32xf32, #tpu.memory_space<vmem>>, %arg2: memref<16x8xf32, #tpu.memory_space<vmem>>) attributes {dimension_semantics = [], scalar_prefetch = 0 : i64, scratch_operands = 0 : i64, tpu.core_type = #tpu.core_type<tc>} {
    %c0 = arith.constant 0 : index
    %c0_0 = arith.constant 0 : index
    %0 = vector.load %arg0[%c0, %c0_0] : memref<16x32xf32, #tpu.memory_space<vmem>>, vector<16x32xf32>
    %c0_1 = arith.constant 0 : index
    %c0_2 = arith.constant 0 : index
    %1 = vector.load %arg1[%c0_1, %c0_2] : memref<96x32xf32, #tpu.memory_space<vmem>>, vector<32x32xf32>
    %c32 = arith.constant 32 : index
    %c0_3 = arith.constant 0 : index
    %2 = vector.load %arg1[%c32, %c0_3] : memref<96x32xf32, #tpu.memory_space<vmem>>, vector<1x32xf32>
    %c40 = arith.constant 40 : index
    %c0_4 = arith.constant 0 : index
    %3 = vector.load %arg1[%c40, %c0_4] : memref<96x32xf32, #tpu.memory_space<vmem>>, vector<32x8xf32>
    %c72 = arith.constant 72 : index
    %c0_5 = arith.constant 0 : index
    %4 = vector.load %arg1[%c72, %c0_5] : memref<96x32xf32, #tpu.memory_space<vmem>>, vector<1x8xf32>
    %c80 = arith.constant 80 : index
    %c0_6 = arith.constant 0 : index
    %5 = vector.load %arg1[%c80, %c0_6] : memref<96x32xf32, #tpu.memory_space<vmem>>, vector<16x16xf32>
    %cst = arith.constant dense<0.000000e+00> : vector<16x32xf32>
    %6 = tpu.matmul %0, %1, %cst {dimension_numbers = #tpu.dot_dimension_numbers<[1], [0], [0], [1], [0, 0, 1, 1], [], []>} : vector<16x32xf32>, vector<32x32xf32>, vector<16x32xf32> -> vector<16x32xf32>
    %7 = vector.broadcast %2 : vector<1x32xf32> to vector<16x32xf32>
    %8 = arith.addf %6, %7 : vector<16x32xf32>
    %cst_7 = arith.constant 0.000000e+00 : f32
    %9 = vector.broadcast %cst_7 : f32 to vector<16x32xf32>
    %10 = arith.maximumf %8, %9 : vector<16x32xf32>
    %cst_8 = arith.constant dense<0.000000e+00> : vector<16x8xf32>
    %11 = tpu.matmul %10, %3, %cst_8 {dimension_numbers = #tpu.dot_dimension_numbers<[1], [0], [0], [1], [0, 0, 1, 1], [], []>} : vector<16x32xf32>, vector<32x8xf32>, vector<16x8xf32> -> vector<16x8xf32>
    %12 = vector.broadcast %4 : vector<1x8xf32> to vector<16x8xf32>
    %13 = arith.addf %11, %12 : vector<16x8xf32>
    %cst_9 = arith.constant dense<0.000000e+00> : vector<16x8xf32>
    %14 = tpu.matmul %5, %13, %cst_9 {dimension_numbers = #tpu.dot_dimension_numbers<[1], [0], [0], [1], [0, 0, 1, 1], [], []>} : vector<16x16xf32>, vector<16x8xf32>, vector<16x8xf32> -> vector<16x8xf32>
    %cst_10 = arith.constant dense<0xFF800000> : vector<16xf32>
    %15 = vector.multi_reduction <maximumf>, %14, %cst_10 [1] : vector<16x8xf32> to vector<16xf32>
    %16 = vector.shape_cast %15 : vector<16xf32> to vector<16x1xf32>
    %17 = vector.broadcast %16 : vector<16x1xf32> to vector<16x8xf32>
    %18 = arith.subf %14, %17 : vector<16x8xf32>
    %19 = math.exp %18 : vector<16x8xf32>
    %cst_11 = arith.constant dense<0.000000e+00> : vector<16xf32>
    %20 = vector.multi_reduction <add>, %19, %cst_11 [1] : vector<16x8xf32> to vector<16xf32>
    %21 = vector.shape_cast %20 : vector<16xf32> to vector<16x1xf32>
    %22 = math.log %21 : vector<16x1xf32>
    %23 = vector.broadcast %22 : vector<16x1xf32> to vector<16x8xf32>
    %24 = arith.subf %18, %23 : vector<16x8xf32>
    %c0_12 = arith.constant 0 : index
    %c0_13 = arith.constant 0 : index
    %25 = vector.load %arg2[%c0_12, %c0_13] : memref<16x8xf32, #tpu.memory_space<vmem>>, vector<16x8xf32>
    tpu.vector_store %arg2[%c0_12, %c0_13], %24 {strides = array<i32>} : memref<16x8xf32, #tpu.memory_space<vmem>>, vector<16x8xf32>,
    return
  }
}

</mosaic_0001>

<bundles_post_ra>
// kernel: tpu_custom_call.1
= control target key start
LH: loop header
LB: loop body
LE: loop exit
PB: predicated region body
PF: predicated region fallthrough
CT: control target
= control target key end

     0   :  { %vm26_vm0 = vcmask 261120   ;;  %vm88_vm1 = vcmask 130048   ;;  %vm118_vm2 = vcmask 64512   ;;  %s242_s1 = inlined_call_operand.vmem [shape: f32[96,32], index: 1, kind: input, shape index: {}]   ;;  %s243_s0 = inlined_call_operand.vmem [shape: f32[16,32], index: 0, kind: input, shape index: {}]   ;;  %s244_s2 = inlined_call_operand.vmem [shape: f32[16,8], index: 2, kind: output, shape index: {}]  }
   0x1   :  { %v16_v0 = vld [vmem:[%s242_s1 + $0x18] sm:$0xff]  ;;  %v15_v1 = vld [vmem:[%s242_s1 + $0x10] sm:$0xff]  ;;  %v14_v2 = vld [vmem:[%s242_s1 + $0x8] sm:$0xff] }
   0x2   :  { %45 = vmatpush.msra.mxu0 %v16_v0  ;;  %155 = vmatpush.msra.mxu3 %v16_v0  ;;  %v21_v3 = vld [vmem:[%s242_s1 + $0x40] sm:$0xff]  ;;  %v12_v6 = vld [vmem:[%s243_s0 + $0x8] sm:$0xff]  ;;  %v20_v7 = vld [vmem:[%s242_s1 + $0x38] sm:$0xff] }
   0x3   :  { %v13_v4 = vld [vmem:[%s242_s1] sm:$0xff]  ;;  %77 = vmatpush.msra.mxu1 %v21_v3  ;;  %v19_v8 = vld [vmem:[%s242_s1 + $0x30] sm:$0xff]  ;;  %v18_v9 = vld [vmem:[%s242_s1 + $0x28] sm:$0xff] }
   0x4   :  { %46 = vmatpush.msra.mxu0 %v15_v1  ;;  %156 = vmatpush.msra.mxu3 %v15_v1  ;;  %v11_v5 = vld [vmem:[%s243_s0] sm:$0xff]  ;;  %v160_v18 = vld [vmem:[%s242_s1 + $0x48] ss:$0 sm:$0xff]  ;;  %v23_v22 = vld [vmem:[%s242_s1 + $0x50] sm:$0xff] }
   0x5   :  { %78 = vmatpush.msra.mxu1 %v20_v7  ;;  %v159_v10 = vld [vmem:[%s242_s1 + $0x20] ss:$0 sm:$0xff]  ;;  %v24_v23 = vld [vmem:[%s242_s1 + $0x58] sm:$0xff] }
   0x6   :  { %47 = vmatpush.msra.mxu0 %v14_v2  ;;  %157 = vmatpush.msra.mxu3 %v14_v2 }
   0x7   :  { %79 = vmatpush.msra.mxu1 %v19_v8 }
   0x8   :  { %48 = vmatpush.msra.mxu0 %v13_v4  ;;  %158 = vmatpush.msra.mxu3 %v13_v4 }
   0x9   :  { %149 = vmatmul.msk.f32.vlgmr.msra.gmra.mxu0 %vm26_vm0, %v11_v5  ;;  %150 = vmatmul.msk.f32.vlgmr.msra.gmra.mxu3 %vm26_vm0, %v12_v6 }
   0xa   :  { %80 = vmatpush.msra.mxu1 %v18_v9 }
  0x86   :  { %v50_v11 = vpop.f32.mrf.mxu0 }
  0x87   :  { %v51_v12 = vadd.f32 %v159_v10, %v50_v11 }
  0x89   :  { %v56_v13 = vmax.f32 %v51_v12, 0.0 }
  0x8b   :  { %151 = vmatmul.msk.f32.vlgmr.msra.gmra.mxu1 %vm26_vm0, %v56_v13 }
  0x8c   :  { %v53_v14 = vpop.f32.mrf.mxu3 }
  0x8d   :  { %v54_v15 = vadd.f32 %v159_v10, %v53_v14 }
  0x8f   :  { %v57_v16 = vmax.f32 %v54_v15, 0.0 }
  0x93   :  { %152 = vmatmul.msk.f32.gmra.mxu1 %vm26_vm0, %v57_v16 }
 0x108   :  { %v82_v17 = vpop.f32.mrf.mxu1 }
 0x109   :  { %v83_v21 = vadd.f32 %v160_v18, %v82_v17 }
 0x110   :  { %v85_v19 = vpop.f32.mrf.mxu1 }
 0x111   :  { %v86_v20 = vadd.f32 %v160_v18, %v85_v19 }
 0x113   :  { %109 = vmatpush.msra.mxu2 %v86_v20 }
 0x115   :  { %110 = vmatpush.msra.mxu2 %v83_v21 }
 0x116   :  { %153 = vmatmul.msk.f32.vlgmr.msra.gmra.mxu2 %vm88_vm1, %v23_v22 }
 0x11e   :  { %154 = vmatmul.msk.f32.gmra.mxu2 %vm88_vm1, %v24_v23 }
 0x199   :  { %v112_v24 = vpop.f32.mrf.mxu2 }
 0x19a   :  { %v119_v25 = vsel %vm118_vm2, %v112_v24, -inf }
 0x19b   :  { %120 = vmax.xlane.f32.xlu0 %v119_v25 }
 0x1a1   :  { %v115_v26 = vpop.f32.mrf.mxu2 }
 0x1a2   :  { %v122_v27 = vsel %vm118_vm2, %v115_v26, -inf }
 0x1a3   :  { %123 = vmax.xlane.f32.xlu0 %v122_v27 }
 0x20e   :  { %v121_v28 = vpop.xlane.xlu0 %120 }
 0x20f   :  { %v125_v29 = vsub.f32 %v112_v24, %v121_v28 }
 0x211   :  { %v127_v30 = vmul.f32 1.442695, %v125_v29 }
 0x213   :  { %161 = vpow2.f32 %v127_v30 }
 0x216   :  { %v124_v31 = vpop.xlane.xlu0 %123 }
 0x217   :  { %v126_v32 = vsub.f32 %v115_v26, %v124_v31 }
 0x219   :  { %v162_v33 = vpop.eup %161  ;;  %v129_v34 = vmul.f32 1.442695, %v126_v32 }
 0x21a   :  { %v131_v35 = vsel %vm118_vm2, %v162_v33, 0.0 }
 0x21b   :  { %163 = vpow2.f32 %v129_v34  ;;  %132 = vadd.xlane.f32.xlu1 %v131_v35 }
 0x221   :  { %v164_v36 = vpop.eup %163 }
 0x222   :  { %v134_v37 = vsel %vm118_vm2, %v164_v36, 0.0 }
 0x223   :  { %135 = vadd.xlane.f32.xlu1 %v134_v37 }
 0x28e   :  { %v133_v38 = vpop.xlane.xlu1 %132 }
 0x28f   :  { %165 = vlog2.f32 %v133_v38 }
 0x295   :  { %v166_v39 = vpop.eup %165 }
 0x296   :  { %v138_v40 = vmul.f32 0.6931472, %v166_v39  ;;  %v136_v41 = vpop.xlane.xlu1 %135 }
 0x297   :  { %167 = vlog2.f32 %v136_v41 }
 0x298   :  { %v141_v42 = vsub.f32 %v125_v29, %v138_v40 }
 0x29a   :  { %143 = vst.msk [vmem:[%s244_s2] sm:$0xff] %vm118_vm2, %v141_v42 }
 0x29d   :  { %v168_v43 = vpop.eup %167 }
 0x29e   :  { %v140_v44 = vmul.f32 0.6931472, %v168_v43 }
 0x2a0   :  { %v142_v45 = vsub.f32 %v126_v32, %v140_v44 }
 0x2a2   :  { %144 = vst.msk [vmem:[%s244_s2 + $0x8] sm:$0xff] %vm118_vm2, %v142_v45 }

</bundles_post_ra>
